<compile_context>
chip_gen: v7x
topology: tpu7x:2x2x1
jax: 0.10.0
libtpu: 0.0.40
codegen_flags: <defaults>
</compile_context>

<pallas_src>
import math
import jax
import jax.numpy as jnp
from jax.experimental import pallas as pl
from jax.experimental.pallas import tpu as pltpu


def _round_up(a, b):
    return (a + b - 1) // b * b


def _gelu_tanh(x):
    # GELU(approximate='tanh'): 0.5*x*(1+tanh(sqrt(2/pi)*(x+0.044715*x^3)))
    c = math.sqrt(2.0 / math.pi)
    return 0.5 * x * (1.0 + jnp.tanh(c * (x + 0.044715 * x * x * x)))


def mlp_kernel(x_ref, w1_ref, b1_ref, w2_ref, b2_ref, o_ref, acc_ref):
    # Grid: (M tiles, H tiles). H axis is the reduction for the 2nd matmul.
    # x_ref:  (tm, Ep)    w1_ref: (Ep, tk)   b1_ref: (1, tk)   [f32]
    # w2_ref: (tk, Ep)    b2_ref: (1, Ep)    [f32]
    # o_ref:  (tm, Ep)    acc_ref: (tm, Ep)  [f32 scratch]
    k = pl.program_id(1)

    @pl.when(k == 0)
    def _():
        acc_ref[...] = jnp.zeros_like(acc_ref)

    # c_fc slice: contraction over full E, only tk output (hidden) columns live.
    h = jnp.dot(x_ref[...], w1_ref[...], preferred_element_type=jnp.float32)
    h = _gelu_tanh(h + b1_ref[...])                       # f32 bias + GELU

    # c_proj partial sum over this tk block of H (f32 accumulation on MXU).
    acc_ref[...] += jnp.dot(h.astype(w2_ref.dtype), w2_ref[...],
                            preferred_element_type=jnp.float32)

    @pl.when(k == pl.num_programs(1) - 1)
    def _():
        o_ref[...] = (acc_ref[...] + b2_ref[...]).astype(o_ref.dtype)


def _pad_cast(a, shape, dtype):
    a = a.astype(dtype)
    if a.shape != shape:
        a = jnp.zeros(shape, dtype).at[tuple(slice(0, s) for s in a.shape)].set(a)
    return a


def mlp_pallas(x, w1, b1, w2, b2, *, tm=512, tk=512,
               matmul_dtype=jnp.bfloat16, vmem_limit_bytes=None):
    """x: [B, T, E]; w1: [E, 4E]; b1: [4E]; w2: [4E, E]; b2: [E]."""
    B, T, E = x.shape
    H = w1.shape[1]
    M = B * T
    out_dtype = x.dtype
    md = out_dtype if matmul_dtype is None else matmul_dtype

    # --- Tile sizing (no divisibility requirements on caller shapes). ---
    tm = _round_up(int(min(tm, _round_up(M, 16))), 16)      # large row tile
    tk = _round_up(int(min(tk, _round_up(H, 128))), 128)    # hidden-dim block
    Mp = _round_up(M, tm)
    Ep = _round_up(E, 128)                                   # lane-dense embed
    Hp = _round_up(H, tk)

    # --- Pad + cast operands (biases stay f32 for full-precision adds).
    # Zero-padded H columns give GELU(0)=0 -> zero contribution to acc;
    # zero-padded E rows/cols are sliced off at the end.
    xp = _pad_cast(x.reshape(M, E), (Mp, Ep), md)
    w1p = _pad_cast(w1, (Ep, Hp), md)
    b1p = _pad_cast(b1.reshape(1, H), (1, Hp), jnp.float32)
    w2p = _pad_cast(w2, (Hp, Ep), md)
    b2p = _pad_cast(b2.reshape(1, E), (1, Ep), jnp.float32)

    grid = (Mp // tm, Hp // tk)

    # --- VMEM plan: double-buffered streamed blocks + f32 accumulator. ---
    mds = jnp.dtype(md).itemsize
    ods = jnp.dtype(out_dtype).itemsize
    vmem_est = (2 * (tm * Ep * mds + Ep * tk * mds + tk * 4
                     + tk * Ep * mds + Ep * 4 + tm * Ep * ods)
                + tm * Ep * 4)
    if vmem_limit_bytes is None:
        # Cap at 64 MiB so the plan is valid on v7x (64 MiB physical VMEM).
        vmem_limit_bytes = min(64 * 1024 * 1024,
                               max(32 * 1024 * 1024, 2 * vmem_est))

    cost = pl.CostEstimate(
        flops=int(4 * Mp * Ep * Hp),                 # two matmuls
        transcendentals=int(Mp * Hp),                # tanh in GELU
        bytes_accessed=int(Mp * Ep * (mds + ods)
                           + grid[0] * (Ep * Hp + Hp * Ep) * mds
                           + grid[0] * (Hp + Ep) * 4),
    )

    out2d = pl.pallas_call(
        mlp_kernel,
        out_shape=jax.ShapeDtypeStruct((Mp, Ep), out_dtype),
        grid_spec=pltpu.PrefetchScalarGridSpec(
            num_scalar_prefetch=0,
            grid=grid,
            in_specs=[
                pl.BlockSpec((tm, Ep), lambda i, k: (i, 0)),   # x tile (row-stationary)
                pl.BlockSpec((Ep, tk), lambda i, k: (0, k)),   # w1 block
                pl.BlockSpec((1, tk), lambda i, k: (0, k)),    # b1 block (f32)
                pl.BlockSpec((tk, Ep), lambda i, k: (k, 0)),   # w2 block
                pl.BlockSpec((1, Ep), lambda i, k: (0, 0)),    # b2 (f32)
            ],
            out_specs=pl.BlockSpec((tm, Ep), lambda i, k: (i, 0)),
            scratch_shapes=[pltpu.VMEM((tm, Ep), jnp.float32)],
        ),
        compiler_params=pltpu.CompilerParams(
            dimension_semantics=("parallel", "arbitrary"),
            vmem_limit_bytes=int(vmem_limit_bytes)),
        cost_estimate=cost,
    )(xp, w1p, b1p, w2p, b2p)

    return out2d[:M, :E].reshape(B, T, E)


def mlp_reference(x, w1, b1, w2, b2, matmul_dtype=None):
    """Pure-JAX reference; optionally mimics the bf16 matmul path."""
    if matmul_dtype is not None:
        xm, w1m, w2m = (a.astype(matmul_dtype) for a in (x, w1, w2))
    else:
        xm, w1m, w2m = x, w1, w2
    h = jnp.dot(xm, w1m, preferred_element_type=jnp.float32) + b1
    h = _gelu_tanh(h)
    if matmul_dtype is not None:
        h = h.astype(matmul_dtype)
    y = jnp.dot(h, w2m, preferred_element_type=jnp.float32) + b2
    return y.astype(x.dtype)


if __name__ == "__main__":
    # config.n_embds = 32 -> hidden = 128 (toy shapes for the correctness run;
    # real GPT-2 E=768/H=3072 is already lane-dense and H-tiled by the wrapper).
    B, T, E = 2, 8, 32
    H = 4 * E

    key = jax.random.PRNGKey(0)
    kx, kw1, kb1, kw2, kb2 = jax.random.split(key, 5)

    x = jax.random.normal(kx, (B, T, E), dtype=jnp.float32)
    w1 = jax.random.normal(kw1, (E, H), dtype=jnp.float32) * 0.02
    b1 = jax.random.normal(kb1, (H,), dtype=jnp.float32) * 0.02
    w2 = jax.random.normal(kw2, (H, E), dtype=jnp.float32) * 0.02
    b2 = jax.random.normal(kb2, (E,), dtype=jnp.float32) * 0.02

    out = jax.block_until_ready(mlp_pallas(x, w1, b1, w2, b2))
    assert out.shape == (B, T, E)

    # Tight check vs a reference using the same bf16-matmul / f32-accum path.
    ref_bf16 = mlp_reference(x, w1, b1, w2, b2, matmul_dtype=jnp.bfloat16)
    assert jnp.allclose(out, ref_bf16, atol=1e-4, rtol=1e-3), "mismatch vs bf16 reference"

    # Loose sanity check vs the full-f32 reference (bf16 rounding only).
    ref_f32 = mlp_reference(x, w1, b1, w2, b2)
    assert jnp.allclose(out, ref_f32, atol=5e-3, rtol=5e-2), "mismatch vs f32 reference"

    print("KERNEL_OK")
</pallas_src>

<mosaic_0001>
module attributes {stable_mosaic.version = 11 : i64} {
  func.func @mlp_kernel(%arg0: i32, %arg1: i32, %arg2: memref<16x128xbf16, #tpu.memory_space<vmem>>, %arg3: memref<128x128xbf16, #tpu.memory_space<vmem>>, %arg4: memref<1x128xf32, #tpu.memory_space<vmem>>, %arg5: memref<128x128xbf16, #tpu.memory_space<vmem>>, %arg6: memref<1x128xf32, #tpu.memory_space<vmem>>, %arg7: memref<16x128xf32, #tpu.memory_space<vmem>>, %arg8: memref<16x128xf32, #tpu.memory_space<vmem>>) attributes {dimension_semantics = [#tpu.dimension_semantics<parallel>, #tpu.dimension_semantics<arbitrary>], iteration_bounds = array<i64: 1, 1>, scalar_prefetch = 0 : i64, scratch_operands = 1 : i64, tpu.core_type = #tpu.core_type<tc>, window_params = [{transform_indices = @transform_0, window_bounds = array<i64: 16, 128>}, {transform_indices = @transform_1, window_bounds = array<i64: 128, 128>}, {transform_indices = @transform_2, window_bounds = array<i64: 1, 128>}, {transform_indices = @transform_3, window_bounds = array<i64: 128, 128>}, {pipeline_mode = #tpu.pipeline_mode<synchronous>, transform_indices = @transform_4, window_bounds = array<i64: 1, 128>}, {transform_indices = @transform_5, window_bounds = array<i64: 16, 128>}]} {
    %c0_i32 = arith.constant 0 : i32
    %0 = arith.cmpi eq, %arg1, %c0_i32 : i32
    %1 = arith.extui %0 : i1 to i32
    %c0_i32_0 = arith.constant 0 : i32
    %2 = arith.cmpi ne, %1, %c0_i32_0 : i32
    scf.if %2 {
      %cst_19 = arith.constant 0.000000e+00 : f32
      %31 = vector.broadcast %cst_19 : f32 to vector<16x128xf32>
      %c0_20 = arith.constant 0 : index
      %c0_21 = arith.constant 0 : index
      %32 = vector.load %arg8[%c0_20, %c0_21] : memref<16x128xf32, #tpu.memory_space<vmem>>, vector<16x128xf32>
      tpu.vector_store %arg8[%c0_20, %c0_21], %31 {strides = array<i32>} : memref<16x128xf32, #tpu.memory_space<vmem>>, vector<16x128xf32>,
    } else {
    }
    %c0 = arith.constant 0 : index
    %c0_1 = arith.constant 0 : index
    %3 = vector.load %arg2[%c0, %c0_1] : memref<16x128xbf16, #tpu.memory_space<vmem>>, vector<16x128xbf16>
    %c0_2 = arith.constant 0 : index
    %c0_3 = arith.constant 0 : index
    %4 = vector.load %arg3[%c0_2, %c0_3] : memref<128x128xbf16, #tpu.memory_space<vmem>>, vector<128x128xbf16>
    %cst = arith.constant dense<0.000000e+00> : vector<16x128xf32>
    %5 = tpu.matmul %3, %4, %cst {dimension_numbers = #tpu.dot_dimension_numbers<[1], [0], [0], [1], [0, 0, 1, 1], [], []>} : vector<16x128xbf16>, vector<128x128xbf16>, vector<16x128xf32> -> vector<16x128xf32>
    %c0_4 = arith.constant 0 : index
    %c0_5 = arith.constant 0 : index
    %6 = vector.load %arg4[%c0_4, %c0_5] : memref<1x128xf32, #tpu.memory_space<vmem>>, vector<1x128xf32>
    %7 = vector.broadcast %6 : vector<1x128xf32> to vector<16x128xf32>
    %8 = arith.addf %5, %7 : vector<16x128xf32>
    %cst_6 = arith.constant 5.000000e-01 : f32
    %9 = vector.broadcast %cst_6 : f32 to vector<16x128xf32>
    %10 = arith.mulf %9, %8 : vector<16x128xf32>
    %cst_7 = arith.constant 4.471500e-02 : f32
    %11 = vector.broadcast %cst_7 : f32 to vector<16x128xf32>
    %12 = arith.mulf %11, %8 : vector<16x128xf32>
    %13 = arith.mulf %12, %8 : vector<16x128xf32>
    %14 = arith.mulf %13, %8 : vector<16x128xf32>
    %15 = arith.addf %8, %14 : vector<16x128xf32>
    %cst_8 = arith.constant 0.797884583 : f32
    %16 = vector.broadcast %cst_8 : f32 to vector<16x128xf32>
    %17 = arith.mulf %16, %15 : vector<16x128xf32>
    %18 = math.tanh %17 : vector<16x128xf32>
    %cst_9 = arith.constant 1.000000e+00 : f32
    %19 = vector.broadcast %cst_9 : f32 to vector<16x128xf32>
    %20 = arith.addf %19, %18 : vector<16x128xf32>
    %21 = arith.mulf %10, %20 : vector<16x128xf32>
    %c0_10 = arith.constant 0 : index
    %c0_11 = arith.constant 0 : index
    %22 = vector.load %arg8[%c0_10, %c0_11] : memref<16x128xf32, #tpu.memory_space<vmem>>, vector<16x128xf32>
    %23 = arith.truncf %21 : vector<16x128xf32> to vector<16x128xbf16>
    %c0_12 = arith.constant 0 : index
    %c0_13 = arith.constant 0 : index
    %24 = vector.load %arg5[%c0_12, %c0_13] : memref<128x128xbf16, #tpu.memory_space<vmem>>, vector<128x128xbf16>
    %cst_14 = arith.constant dense<0.000000e+00> : vector<16x128xf32>
    %25 = tpu.matmul %23, %24, %cst_14 {dimension_numbers = #tpu.dot_dimension_numbers<[1], [0], [0], [1], [0, 0, 1, 1], [], []>} : vector<16x128xbf16>, vector<128x128xbf16>, vector<16x128xf32> -> vector<16x128xf32>
    %26 = arith.addf %22, %25 : vector<16x128xf32>
    %c0_15 = arith.constant 0 : index
    %c0_16 = arith.constant 0 : index
    %27 = vector.load %arg8[%c0_15, %c0_16] : memref<16x128xf32, #tpu.memory_space<vmem>>, vector<16x128xf32>
    tpu.vector_store %arg8[%c0_15, %c0_16], %26 {strides = array<i32>} : memref<16x128xf32, #tpu.memory_space<vmem>>, vector<16x128xf32>,
    %c0_i32_17 = arith.constant 0 : i32
    %28 = arith.cmpi eq, %arg1, %c0_i32_17 : i32
    %29 = arith.extui %28 : i1 to i32
    %c0_i32_18 = arith.constant 0 : i32
    %30 = arith.cmpi ne, %29, %c0_i32_18 : i32
    scf.if %30 {
      %c0_19 = arith.constant 0 : index
      %c0_20 = arith.constant 0 : index
      %31 = vector.load %arg8[%c0_19, %c0_20] : memref<16x128xf32, #tpu.memory_space<vmem>>, vector<16x128xf32>
      %c0_21 = arith.constant 0 : index
      %c0_22 = arith.constant 0 : index
      %32 = vector.load %arg6[%c0_21, %c0_22] : memref<1x128xf32, #tpu.memory_space<vmem>>, vector<1x128xf32>
      %33 = vector.broadcast %32 : vector<1x128xf32> to vector<16x128xf32>
      %34 = arith.addf %31, %33 : vector<16x128xf32>
      %c0_23 = arith.constant 0 : index
      %c0_24 = arith.constant 0 : index
      %35 = vector.load %arg7[%c0_23, %c0_24] : memref<16x128xf32, #tpu.memory_space<vmem>>, vector<16x128xf32>
      tpu.vector_store %arg7[%c0_23, %c0_24], %34 {strides = array<i32>} : memref<16x128xf32, #tpu.memory_space<vmem>>, vector<16x128xf32>,
    } else {
    }
    return
  }
  func.func @transform_0(%arg0: i32, %arg1: i32) -> (i32, i32) {
    %c0_i32 = arith.constant 0 : i32
    %c0_i32_0 = arith.constant 0 : i32
    return %arg0, %c0_i32 : i32, i32
  }
  func.func @transform_1(%arg0: i32, %arg1: i32) -> (i32, i32) {
    %c0_i32 = arith.constant 0 : i32
    %c0_i32_0 = arith.constant 0 : i32
    return %c0_i32, %arg1 : i32, i32
  }
  func.func @transform_2(%arg0: i32, %arg1: i32) -> (i32, i32) {
    %c0_i32 = arith.constant 0 : i32
    %c0_i32_0 = arith.constant 0 : i32
    return %c0_i32, %arg1 : i32, i32
  }
  func.func @transform_3(%arg0: i32, %arg1: i32) -> (i32, i32) {
    %c0_i32 = arith.constant 0 : i32
    %c0_i32_0 = arith.constant 0 : i32
    return %arg1, %c0_i32 : i32, i32
  }
  func.func @transform_4(%arg0: i32, %arg1: i32) -> (i32, i32) {
    %c0_i32 = arith.constant 0 : i32
    %c0_i32_0 = arith.constant 0 : i32
    %c0_i32_1 = arith.constant 0 : i32
    return %c0_i32, %c0_i32_0 : i32, i32
  }
  func.func @transform_5(%arg0: i32, %arg1: i32) -> (i32, i32) {
    %c0_i32 = arith.constant 0 : i32
    %c0_i32_0 = arith.constant 0 : i32
    return %arg0, %c0_i32 : i32, i32
  }
}

</mosaic_0001>

<bundles_post_ra>
// kernel: tpu_custom_call.1
= control target key start
LH: loop header
LB: loop body
LE: loop exit
PB: predicated region body
PF: predicated region fallthrough
CT: control target
= control target key end

     0   :  { %10 = vsyncpa [#allocation4], 0  ;;  %s665_s0 = inlined_call_operand.hbm [shape: bf16[16,128], index: 0, kind: input, shape index: {}]   ;;  %s666_s1 = inlined_call_operand.hbm [shape: bf16[128,128], index: 1, kind: input, shape index: {}]   ;;  %s667_s2 = inlined_call_operand.vmem [shape: f32[1,128], index: 2, kind: input, shape index: {}]   ;;  %s668_s3 = inlined_call_operand.hbm [shape: bf16[128,128], index: 3, kind: input, shape index: {}]   ;;  %s669_s4 = inlined_call_operand.vmem [shape: f32[1,128], index: 4, kind: input, shape index: {}]   ;;  %s670_s5 = inlined_call_operand.hbm [shape: f32[16,128], index: 5, kind: output, shape index: {}]  }
   0x1   :  { %11 = vsyncpa [#allocation7], 0 }
   0x2   :  { %12 = vsyncpa [#allocation5], 0  ;;  %s555_s18 = smov [#allocation6]   ;;  %s556_s20 = smov [#allocation3]  }
   0x3   :  { %s30_s19 = sshll.u32 %s555_s18, 4  ;;  %s18_s21 = sshll.u32 %s556_s20, 4  ;;  %s31_s19 = int_to_ptr.vmem [resolvable:$true] %s30_s19  ;;  %s595_s21 = int_to_ptr.vmem [resolvable:$true] %s18_s21 }
   0x4   :  { %s461_s24 = scalar_lea.hbm %s666_s1, 1024 }
   0x5   :  { %p462_p0 = scmp.ne.s32.totalorder %s666_s1, %s461_s24  ;;  %p465_p1 = scmp.lt.u32.totalorder %s461_s24, %s666_s1 }
   0x7   :  { %p467_p2 = pnand %p465_p1, %p462_p0 }
   0x9   :  { %470 = shalt.err (!%p467_p2)
}
   0xa   :  { %s471_s29 = scalar_lea.vmem %s31_s19, 1024  ;;  %p476_p4 = scmp.lt.s32.totalorder %s31_s19, %s31_s19 }
   0xb   :  { %p472_p3 = scmp.ne.s32.totalorder %s31_s19, %s471_s29  ;;  %p477_p5 = scmp.lt.s32.totalorder %s471_s29, %s471_s29 }
   0xd   :  { %p478_p6 = por %p477_p5, %p476_p4 }
   0xf   :  { %p479_p7 = pnand %p478_p6, %p472_p3 }
  0x11   :  { %482 = shalt.err (!%p479_p7)
}
  0x12   :  { %s557_s30 = smov 64   ;;  %s558_s6 = smov 4  }
  0x13   :  { %36 = dma.hbm_to_vmem [thread:$0]  %s666_s1, 1024, %s31_s19, [#allocation7], %s557_s30, %s557_s30, %s558_s6  }
  0x14   :  { %s483_s11 = scalar_lea.hbm %s665_s0, 128 }
  0x15   :  { %p484_p8 = scmp.ne.s32.totalorder %s665_s0, %s483_s11  ;;  %p487_p9 = scmp.lt.u32.totalorder %s483_s11, %s665_s0 }
  0x17   :  { %p489_p10 = pnand %p487_p9, %p484_p8 }
  0x19   :  { %492 = shalt.err (!%p489_p10)
}
  0x1a   :  { %s493_s16 = scalar_lea.vmem %s595_s21, 128  ;;  %p498_p12 = scmp.lt.s32.totalorder %s595_s21, %s595_s21 }
  0x1b   :  { %p494_p11 = scmp.ne.s32.totalorder %s595_s21, %s493_s16  ;;  %p499_p13 = scmp.lt.s32.totalorder %s493_s16, %s493_s16 }
  0x1d   :  { %p500_p0 = por %p499_p13, %p498_p12 }
  0x1f   :  { %p501_p1 = pnand %p500_p0, %p494_p11 }
  0x21   :  { %504 = shalt.err (!%p501_p1)
}
  0x22   :  { %24 = dma.hbm_to_vmem [thread:$0]  %s665_s0, 128, %s595_s21, [#allocation4], %s557_s30, %s557_s30, %s558_s6  }
  0x23   :  { %s559_s18 = smov [#allocation8]   ;;  %s505_s23 = scalar_lea.hbm %s668_s3, 1024 }
  0x24   :  { %s44_s19 = sshll.u32 %s559_s18, 4  ;;  %p506_p2 = scmp.ne.s32.totalorder %s668_s3, %s505_s23  ;;  %s45_s19 = int_to_ptr.vmem [resolvable:$true] %s44_s19 }
  0x25   :  { %p509_p3 = scmp.lt.u32.totalorder %s505_s23, %s668_s3 }
  0x27   :  { %p511_p4 = pnand %p509_p3, %p506_p2 }
  0x29   :  { %514 = shalt.err (!%p511_p4)
}
  0x2a   :  { %s515_s28 = scalar_lea.vmem %s45_s19, 1024  ;;  %p520_p6 = scmp.lt.s32.totalorder %s45_s19, %s45_s19 }
  0x2b   :  { %p516_p5 = scmp.ne.s32.totalorder %s45_s19, %s515_s28  ;;  %p521_p7 = scmp.lt.s32.totalorder %s515_s28, %s515_s28 }
  0x2d   :  { %p522_p8 = por %p521_p7, %p520_p6 }
  0x2f   :  { %p523_p9 = pnand %p522_p8, %p516_p5 }
  0x31   :  { %526 = shalt.err (!%p523_p9)
}
  0x32   :  { %50 = dma.hbm_to_vmem [thread:$0]  %s668_s3, 1024, %s45_s19, [#allocation7], %s557_s30, %s557_s30, %s558_s6  }
  0x33   :  { %549 = dma.done.wait [#allocation4], 128  }
  0x34   :  { %550 = vsyncadd [#allocation4], 4294967168 }
  0x35   :  { %551 = dma.done.wait [#allocation7], 2048  }
  0x36   :  { %552 = vsyncadd [#allocation7], 4294965248  ;;  %v560_v0 = vmov 0.0   ;;  %vm561_vm0 = vmmov 0   ;;  %v440_v1 = vld [vmem:[#allocation6] sm:$0xff]   ;;  %v441_v2 = vld [vmem:[#allocation6 + $0x8] sm:$0xff]  }
  0x37   :  { %390 = vmatprep.subr.bf16.mxu0 %v560_v0  ;;  %406 = vmatprep.mubr.msk.bf16.mxu0 %vm561_vm0, %v560_v0  ;;  %v442_v3 = vld [vmem:[#allocation6 + $0x10] sm:$0xff]   ;;  %v443_v4 = vld [vmem:[#allocation6 + $0x18] sm:$0xff]   ;;  %v444_v5 = vld [vmem:[#allocation6 + $0x20] sm:$0xff]   ;;  %s562_s6 = smov [#allocation9]  }
  0x38   :  { %410 = vmatprep.subr.bf16.mxu1 %v560_v0  ;;  %426 = vmatprep.mubr.msk.bf16.mxu1 %vm561_vm0, %v560_v0  ;;  %v445_v6 = vld [vmem:[#allocation6 + $0x28] sm:$0xff]   ;;  %v446_v7 = vld [vmem:[#allocation6 + $0x30] sm:$0xff]   ;;  %v447_v8 = vld [vmem:[#allocation6 + $0x38] sm:$0xff]   ;;  %s340_s7 = sshll.u32 %s562_s6, 4  ;;  %s341_s7 = int_to_ptr.vmem [resolvable:$true] %s340_s7 }
  0x39   :  { %391 = vmatpush3.bf16.msra.mxu0 %v440_v1  ;;  %v448_v9 = vld [vmem:[#allocation3] sm:$0xff]   ;;  %v449_v10 = vld [vmem:[#allocation8] sm:$0xff]   ;;  %v450_v11 = vld [vmem:[#allocation8 + $0x8] sm:$0xff]   ;;  %s527_s8 = scalar_lea.vmem %s341_s7, 256  ;;  %p532_p11 = scmp.lt.s32.totalorder %s341_s7, %s341_s7 }
  0x3a   :  { %392 = vmatprep.subr.bf16.mxu0 %v560_v0  ;;  %411 = vmatpush3.bf16.msra.mxu1 %v449_v10  ;;  %v451_v12 = vld [vmem:[#allocation8 + $0x10] sm:$0xff]   ;;  %v452_v13 = vld [vmem:[#allocation8 + $0x18] sm:$0xff]   ;;  %v453_v14 = vld [vmem:[#allocation8 + $0x20] sm:$0xff]   ;;  %p528_p10 = scmp.ne.s32.totalorder %s341_s7, %s527_s8  ;;  %p533_p12 = scmp.lt.s32.totalorder %s527_s8, %s527_s8 }
  0x3b   :  { %412 = vmatprep.subr.bf16.mxu1 %v560_v0  ;;  %v454_v15 = vld [vmem:[#allocation8 + $0x28] sm:$0xff]   ;;  %v455_v16 = vld [vmem:[#allocation8 + $0x30] sm:$0xff]   ;;  %v456_v17 = vld [vmem:[#allocation8 + $0x38] sm:$0xff]  }
  0x3c   :  { %v353_v18 = vld [vmem:[%s667_s2] ss:$0 sm:$0xff]  ;;  %p534_p13 = por %p533_p12, %p532_p11 }
  0x3d   :  { %393 = vmatpush3.bf16.msra.mxu0 %v441_v2  ;;  %v371_v44 = vld [vmem:[%s669_s4] ss:$0 sm:$0xff] }
  0x3e   :  { %394 = vmatprep.subr.bf16.mxu0 %v560_v0  ;;  %413 = vmatpush3.bf16.msra.mxu1 %v450_v11  ;;  %p535_p0 = pnand %p534_p13, %p528_p10 }
  0x3f   :  { %414 = vmatprep.subr.bf16.mxu1 %v560_v0 }
  0x41   :  { %395 = vmatpush3.bf16.msra.mxu0 %v442_v3 }
  0x42   :  { %396 = vmatprep.subr.bf16.mxu0 %v560_v0  ;;  %415 = vmatpush3.bf16.msra.mxu1 %v451_v12 }
  0x43   :  { %416 = vmatprep.subr.bf16.mxu1 %v560_v0 }
  0x45   :  { %397 = vmatpush3.bf16.msra.mxu0 %v443_v4 }
  0x46   :  { %398 = vmatprep.subr.bf16.mxu0 %v560_v0  ;;  %417 = vmatpush3.bf16.msra.mxu1 %v452_v13 }
  0x47   :  { %418 = vmatprep.subr.bf16.mxu1 %v560_v0 }
  0x49   :  { %399 = vmatpush3.bf16.msra.mxu0 %v444_v5 }
  0x4a   :  { %400 = vmatprep.subr.bf16.mxu0 %v560_v0  ;;  %419 = vmatpush3.bf16.msra.mxu1 %v453_v14 }
  0x4b   :  { %420 = vmatprep.subr.bf16.mxu1 %v560_v0 }
  0x4d   :  { %401 = vmatpush3.bf16.msra.mxu0 %v445_v6 }
  0x4e   :  { %402 = vmatprep.subr.bf16.mxu0 %v560_v0  ;;  %421 = vmatpush3.bf16.msra.mxu1 %v454_v15 }
  0x4f   :  { %422 = vmatprep.subr.bf16.mxu1 %v560_v0 }
  0x51   :  { %403 = vmatpush3.bf16.msra.mxu0 %v446_v7 }
  0x52   :  { %404 = vmatprep.subr.bf16.mxu0 %v560_v0  ;;  %423 = vmatpush3.bf16.msra.mxu1 %v455_v16 }
  0x53   :  { %424 = vmatprep.subr.bf16.mxu1 %v560_v0 }
  0x55   :  { %405 = vmatpush3.bf16.msra.mxu0 %v447_v8 }
  0x56   :  { %425 = vmatpush3.bf16.msra.mxu1 %v456_v17 }
  0x58   :  { %407 = vmatmul.mubr.bf16.vlgmr.msra.gmra.mrb[0].mxu0 %v448_v9 }
 0x12b   :  { %v182_v19 = vpop.f32.mrb[0].mxu0 }
 0x12c   :  { %v183_v20 = vadd.f32 %v353_v18, %v182_v19  ;;  %v408_v21 = vpop.f32.mrb[1].mxu0 }
 0x12d   :  { %v185_v22 = vpop.f32.mrb[2].mxu0 }
 0x12e   :  { %v191_v23 = vmul.f32 0.044715, %v183_v20  ;;  %v186_v24 = vadd.f32 %v353_v18, %v185_v22  ;;  %v409_v25 = vpop.f32.mrb[3].mxu0  ;;  %v189_v38 = vmul.f32 0.5, %v183_v20 }
 0x130   :  { %v193_v26 = vmul.f32 %v191_v23, %v183_v20  ;;  %v192_v27 = vmul.f32 0.044715, %v186_v24  ;;  %v190_v39 = vmul.f32 0.5, %v186_v24 }
 0x132   :  { %v195_v28 = vmul.f32 %v193_v26, %v183_v20  ;;  %v194_v29 = vmul.f32 %v192_v27, %v186_v24 }
 0x134   :  { %v196_v30 = vmul.f32 %v194_v29, %v186_v24  ;;  %v197_v31 = vadd.f32 %v195_v28, %v183_v20 }
 0x136   :  { %v198_v32 = vadd.f32 %v196_v30, %v186_v24  ;;  %v199_v33 = vmul.f32 0.7978846, %v197_v31 }
 0x138   :  { %v200_v34 = vmul.f32 0.7978846, %v198_v32  ;;  %457 = vtanh.f32 %v199_v33 }
 0x13a   :  { %459 = vtanh.f32 %v200_v34 }
 0x142   :  { %v458_v35 = vpop.eup %457 }
 0x143   :  { %v203_v36 = vadd.f32 1.0, %v458_v35 }
 0x144   :  { %v460_v37 = vpop.eup %459 }
 0x145   :  { %v204_v40 = vadd.f32 1.0, %v460_v37  ;;  %v205_v41 = vmul.f32 %v203_v36, %v189_v38 }
 0x147   :  { %v206_v42 = vmul.f32 %v204_v40, %v190_v39 }
 0x149   :  { %v209_v43 = vpack.c.bf16 %v206_v42, %v205_v41 }
 0x14b   :  { %427 = vmatmul.mubr.bf16.vlgmr.msra.gmra.mrb[0].mxu1 %v209_v43 }
 0x21e   :  { %v308_v45 = vpop.f32.mrb[0].mxu1 }
 0x21f   :  { %v331_v46 = vadd.f32 %v371_v44, %v308_v45  ;;  %v428_v47 = vpop.f32.mrb[1].mxu1 }
 0x220   :  { %v311_v48 = vpop.f32.mrb[2].mxu1 }
 0x221   :  { %333 = vst [vmem:[#allocation9] sm:$0xff] %v331_v46  ;;  %v332_v49 = vadd.f32 %v371_v44, %v311_v48  ;;  %v429_v50 = vpop.f32.mrb[3].mxu1 }
 0x223   :  { %334 = vst [vmem:[#allocation9 + $0x8] sm:$0xff] %v332_v49 }
 0x224   :  { %538 = shalt.err (!%p535_p0)
}
 0x225   :  { %s539_s10 = scalar_lea.hbm %s670_s5, 256 }
 0x226   :  { %p540_p1 = scmp.ne.s32.totalorder %s670_s5, %s539_s10  ;;  %p543_p2 = scmp.lt.u32.totalorder %s539_s10, %s670_s5 }
 0x228   :  { %p545_p3 = pnand %p543_p2, %p540_p1 }
 0x22a   :  { %548 = shalt.err (!%p545_p3)
}
 0x22b   :  { %s563_s15 = smov 128   ;;  %s564_s16 = smov 8  }
 0x22c   :  { %346 = dma.vmem_to_hbm [thread:$0]  %s341_s7, 256, %s670_s5, [#allocation5], %s563_s15, %s563_s15, %s564_s16  }
 0x22d   :  { %553 = dma.done.wait [#allocation5], 256  }
 0x22e   :  { %554 = vsyncadd [#allocation5], 4294967040 }
 0x22f   :  { %350 = vsyncpa [#allocation4], 1 }
 0x230   :  { %351 = vsyncpa [#allocation7], 1 }
 0x231   :  { %352 = vsyncpa [#allocation5], 1 }

</bundles_post_ra>
